<compile_context>
chip_gen: v5e
topology: v5e:2x2
jax: 0.10.0
libtpu: 0.0.40
codegen_flags: <defaults>
</compile_context>

<pallas_src>
import functools

import numpy as np
import jax
import jax.numpy as jnp
from jax import lax
from jax.experimental import pallas as pl
from jax.experimental.pallas import tpu as pltpu

LANE = 128  # TPU lane width; point index is padded up to a multiple of this.


def _fps_kernel(pts_ref, idx_ref, *, n_valid):
    """One batch element per grid step.

    pts_ref : (3, N_pad) f32  VMEM — x/y/z rows, point index on the lane axis
                                     (lanes >= n_valid are zero padding).
    idx_ref : (1, M)     i32  VMEM — selected indices, written once at the end.
    """
    n_pad = pts_ref.shape[1]
    m = idx_ref.shape[1]

    lane_ids = lax.broadcasted_iota(jnp.int32, (1, n_pad), 1)   # point ids on lanes
    k_ids = lax.broadcasted_iota(jnp.int32, (1, m), 1)          # output slot ids

    # Padded lanes start at -1 so they can never win the argmax
    # (real squared distances are always >= 0).
    dist0 = jnp.where(lane_ids < n_valid, jnp.float32(1e38), jnp.float32(-1.0))
    idx0 = jnp.zeros((1, m), dtype=jnp.int32)

    def body(k, carry):
        cur, dist, idx_acc = carry

        # idx[k] = cur  (masked lane update; no dynamic store needed).
        idx_acc = jnp.where(k_ids == k, cur, idx_acc)

        pts = pts_ref[...]                                    # (3, N_pad), from VMEM

        # Coordinates of the currently selected point: masked lane-reduce
        # (exactly one lane is non-zero per row, so the sum is exact).
        sel = jnp.where(lane_ids == cur, pts, jnp.float32(0.0))
        cvec = jnp.sum(sel, axis=1, keepdims=True)            # (3, 1)

        # Squared distance of every point to the selected point, lane-dense.
        diff = pts - cvec                                     # (3, N_pad)
        d = jnp.sum(diff * diff, axis=0, keepdims=True)       # (1, N_pad)
        new_dist = jnp.minimum(dist, d)

        # argmax with first-occurrence tie-break (matches np.argmax).
        maxd = jnp.max(new_dist)
        cand = jnp.where(new_dist >= maxd, lane_ids, jnp.int32(n_pad))
        nxt = jnp.min(cand).astype(jnp.int32)
        return nxt, new_dist, idx_acc

    _, _, idx_acc = lax.fori_loop(0, m, body, (jnp.int32(0), dist0, idx0))
    idx_ref[...] = idx_acc


@functools.partial(jax.jit, static_argnums=1)
def farthest_sample(inp, npoints):
    """inp: (B, N, 3) float32 -> (out (B, npoints, 3) f32, idx (B, npoints) i32)."""
    B, N, C = inp.shape
    assert C == 3
    inp_f32 = inp.astype(jnp.float32)

    # Glue: transpose to coordinate-on-sublane / point-on-lane layout and pad
    # the point axis to a multiple of the lane width.
    n_pad = ((N + LANE - 1) // LANE) * LANE
    pts = jnp.transpose(inp_f32, (0, 2, 1))                    # (B, 3, N)
    pts = jnp.pad(pts, ((0, 0), (0, 0), (0, n_pad - N)))       # (B, 3, N_pad)

    idx3 = pl.pallas_call(
        functools.partial(_fps_kernel, n_valid=N),
        out_shape=jax.ShapeDtypeStruct((B, 1, npoints), jnp.int32),
        grid=(B,),
        in_specs=[pl.BlockSpec((None, 3, n_pad), lambda b: (b, 0, 0))],
        out_specs=pl.BlockSpec((None, 1, npoints), lambda b: (b, 0, 0)),
        compiler_params=pltpu.CompilerParams(dimension_semantics=("parallel",)),
    )(pts)

    idx = idx3[:, 0, :]                                        # (B, npoints) int32
    # Final gather (gatherpoint_forward): trivial, done outside the kernel.
    out = jnp.take_along_axis(inp_f32, idx[..., None], axis=1)  # (B, npoints, 3)
    return out, idx


def fps_reference(inp, npoints):
    """Pure-numpy reference reproducing the CUDA FPS + gather semantics."""
    inp = np.asarray(inp, dtype=np.float32)
    B, N, _ = inp.shape
    idx = np.zeros((B, npoints), dtype=np.int32)
    out = np.zeros((B, npoints, 3), dtype=np.float32)
    for b in range(B):
        dist = np.full((N,), 1e38, dtype=np.float32)
        cur = 0
        for k in range(npoints):
            idx[b, k] = cur
            out[b, k] = inp[b, cur]
            d = ((inp[b] - inp[b, cur]) ** 2).sum(-1).astype(np.float32)
            dist = np.minimum(dist, d)
            cur = int(np.argmax(dist))
    return out, idx


# TODO(synk): backward pass (gatherpoint_backward scatter-add) not implemented;
# only the forward semantics of FarthestSample are reproduced here.

if __name__ == "__main__":
    key = jax.random.PRNGKey(0)
    B, N, NPOINTS = 2, 64, 16
    inp = jax.random.normal(key, (B, N, 3), dtype=jnp.float32)

    out, idx = farthest_sample(inp, NPOINTS)
    out, idx = jax.block_until_ready((out, idx))

    # Shape / dtype contract (matches torch: out float32 (B,M,3), idx int32 (B,M)).
    assert out.shape == (B, NPOINTS, 3) and out.dtype == jnp.float32
    assert idx.shape == (B, NPOINTS) and idx.dtype == jnp.int32

    # Correctness vs. numpy reference.
    ref_out, ref_idx = fps_reference(np.asarray(inp), NPOINTS)
    assert np.array_equal(np.asarray(idx), ref_idx), (np.asarray(idx), ref_idx)
    assert np.allclose(np.asarray(out), ref_out, atol=0.0, rtol=0.0)

    # Self-consistency: out is exactly inp gathered at idx.
    gathered = np.take_along_axis(
        np.asarray(inp), np.asarray(idx)[..., None].astype(np.int64), axis=1
    )
    assert np.allclose(np.asarray(out), gathered)

    print("KERNEL_OK")
</pallas_src>

<mosaic_0001>
module attributes {stable_mosaic.version = 11 : i64} {
  func.func @_fps_kernel(%arg0: i32, %arg1: memref<1x3x128xf32, #tpu.memory_space<vmem>>, %arg2: memref<1x1x16xi32, #tpu.memory_space<vmem>>) attributes {dimension_semantics = [#tpu.dimension_semantics<parallel>], iteration_bounds = array<i64: 2>, scalar_prefetch = 0 : i64, scratch_operands = 0 : i64, tpu.core_type = #tpu.core_type<tc>, window_params = [{transform_indices = @transform_0, window_bounds = array<i64: 1, 3, 128>}, {transform_indices = @transform_1, window_bounds = array<i64: 1, 1, 16>}]} {
    %0 = tpu.iota {dimensions = array<i32: 1>} : vector<1x128xi32>
    %1 = tpu.iota {dimensions = array<i32: 1>} : vector<1x16xi32>
    %c64_i32 = arith.constant 64 : i32
    %2 = vector.broadcast %c64_i32 : i32 to vector<1x128xi32>
    %3 = arith.cmpi slt, %0, %2 : vector<1x128xi32>
    %cst = arith.constant 9.99999968E+37 : f32
    %cst_0 = arith.constant -1.000000e+00 : f32
    %4 = vector.broadcast %cst : f32 to vector<1x128xf32>
    %5 = vector.broadcast %cst_0 : f32 to vector<1x128xf32>
    %6 = arith.select %3, %4, %5 : vector<1x128xi1>, vector<1x128xf32>
    %c0_i32 = arith.constant 0 : i32
    %7 = vector.broadcast %c0_i32 : i32 to vector<1x16xi32>
    %c0_i32_1 = arith.constant 0 : i32
    %c0_i32_2 = arith.constant 0 : i32
    %c16_i32 = arith.constant 16 : i32
    %8 = arith.addi %c0_i32_2, %c16_i32 : i32
    %c1_i32 = arith.constant 1 : i32
    %9:3 = scf.for %arg3 = %c0_i32_2 to %8 step %c1_i32 iter_args(%arg4 = %c0_i32_1, %arg5 = %6, %arg6 = %7) -> (i32, vector<1x128xf32>, vector<1x16xi32>)  : i32 {
      %13 = vector.broadcast %arg3 : i32 to vector<1x16xi32>
      %14 = arith.cmpi eq, %1, %13 : vector<1x16xi32>
      %15 = vector.broadcast %arg4 : i32 to vector<1x16xi32>
      %16 = arith.select %14, %15, %arg6 : vector<1x16xi1>, vector<1x16xi32>
      %c0_6 = arith.constant 0 : index
      %c0_7 = arith.constant 0 : index
      %c0_8 = arith.constant 0 : index
      %17 = vector.load %arg1[%c0_6, %c0_7, %c0_8] : memref<1x3x128xf32, #tpu.memory_space<vmem>>, vector<1x3x128xf32>
      %18 = vector.shape_cast %17 : vector<1x3x128xf32> to vector<3x128xf32>
      %19 = vector.broadcast %arg4 : i32 to vector<1x128xi32>
      %20 = arith.cmpi eq, %0, %19 : vector<1x128xi32>
      %cst_9 = arith.constant 0.000000e+00 : f32
      %21 = vector.shape_cast %20 : vector<1x128xi1> to vector<1x128xi1>
      %22 = vector.broadcast %21 : vector<1x128xi1> to vector<3x128xi1>
      %23 = vector.broadcast %cst_9 : f32 to vector<3x128xf32>
      %24 = arith.select %22, %18, %23 : vector<3x128xi1>, vector<3x128xf32>
      %cst_10 = arith.constant dense<0.000000e+00> : vector<3xf32>
      %25 = vector.multi_reduction <add>, %24, %cst_10 [1] : vector<3x128xf32> to vector<3xf32>
      %26 = vector.shape_cast %25 : vector<3xf32> to vector<3x1xf32>
      %27 = vector.broadcast %26 : vector<3x1xf32> to vector<3x128xf32>
      %28 = arith.subf %18, %27 : vector<3x128xf32>
      %29 = arith.mulf %28, %28 : vector<3x128xf32>
      %cst_11 = arith.constant dense<0.000000e+00> : vector<128xf32>
      %30 = vector.multi_reduction <add>, %29, %cst_11 [0] : vector<3x128xf32> to vector<128xf32>
      %31 = vector.shape_cast %30 : vector<128xf32> to vector<1x128xf32>
      %32 = arith.minimumf %arg5, %31 : vector<1x128xf32>
      %33 = vector.shape_cast %32 : vector<1x128xf32> to vector<1x1x128xf32>
      %cst_12 = arith.constant dense<0xFF800000> : vector<1xf32>
      %34 = vector.multi_reduction <maximumf>, %33, %cst_12 [1, 2] : vector<1x1x128xf32> to vector<1xf32>
      %35 = vector.shape_cast %34 : vector<1xf32> to vector<1x1x1xf32>
      %36 = vector.extract %35[0, 0, 0] : f32 from vector<1x1x1xf32>
      %37 = vector.broadcast %36 : f32 to vector<1x128xf32>
      %38 = arith.cmpf oge, %32, %37 : vector<1x128xf32>
      %c128_i32 = arith.constant 128 : i32
      %39 = vector.broadcast %c128_i32 : i32 to vector<1x128xi32>
      %40 = arith.select %38, %0, %39 : vector<1x128xi1>, vector<1x128xi32>
      %41 = vector.shape_cast %40 : vector<1x128xi32> to vector<1x1x128xi32>
      %cst_13 = arith.constant dense<2147483647> : vector<1xi32>
      %42 = vector.multi_reduction <minsi>, %41, %cst_13 [1, 2] : vector<1x1x128xi32> to vector<1xi32>
      %43 = vector.shape_cast %42 : vector<1xi32> to vector<1x1x1xi32>
      %44 = vector.extract %43[0, 0, 0] : i32 from vector<1x1x1xi32>
      scf.yield %44, %32, %16 : i32, vector<1x128xf32>, vector<1x16xi32>
    }
    %c16_i32_3 = arith.constant 16 : i32
    %c0 = arith.constant 0 : index
    %c0_4 = arith.constant 0 : index
    %c0_5 = arith.constant 0 : index
    %10 = vector.load %arg2[%c0, %c0_4, %c0_5] : memref<1x1x16xi32, #tpu.memory_space<vmem>>, vector<1x1x16xi32>
    %11 = vector.shape_cast %10 : vector<1x1x16xi32> to vector<1x16xi32>
    %12 = vector.shape_cast %9#2 : vector<1x16xi32> to vector<1x1x16xi32>
    tpu.vector_store %arg2[%c0, %c0_4, %c0_5], %12 {strides = array<i32>} : memref<1x1x16xi32, #tpu.memory_space<vmem>>, vector<1x1x16xi32>,
    return
  }
  func.func @transform_0(%arg0: i32) -> (i32, i32, i32) {
    %c0_i32 = arith.constant 0 : i32
    %c0_i32_0 = arith.constant 0 : i32
    %c0_i32_1 = arith.constant 0 : i32
    return %arg0, %c0_i32, %c0_i32_0 : i32, i32, i32
  }
  func.func @transform_1(%arg0: i32) -> (i32, i32, i32) {
    %c0_i32 = arith.constant 0 : i32
    %c0_i32_0 = arith.constant 0 : i32
    %c0_i32_1 = arith.constant 0 : i32
    return %arg0, %c0_i32, %c0_i32_0 : i32, i32, i32
  }
}

</mosaic_0001>

<bundles_post_ra>
// kernel: farthest_sample.1
= control target key start
LH: loop header
LB: loop body
LE: loop exit
PB: predicated region body
PF: predicated region fallthrough
CT: control target
= control target key end

     0   :  { %s334_s6 = smov 0   ;;  %s383_s0 = inlined_call_operand.vmem [shape: f32[2,3,128], index: 0, kind: input, shape index: {}]   ;;  %s384_s1 = inlined_call_operand.vmem [shape: s32[2,1,16], index: 1, kind: output, shape index: {}]  }
   0x1 LB: > { %s230_s7 = sadd.s32 4294967295, %s305_s6   ;;  %p234_p0 = scmp.ge.s32.totalorder %s305_s6, 1  ;;  %s305_s6 = sphi %s334_s6, %s11_s6  }
   0x2   : > { %p86_p1 = scmp.lt.s32.totalorder %s305_s6, 3 }
   0x4   : > { %p87_p2 = pnand %p234_p0, %p86_p1 }
   0x5   : > { %p103_p3 = scmp.lt.s32.totalorder (!%p87_p2), %s230_s7, 1  ;;  %s357_s15 = smov (!%p87_p2), 0  }
   0x6   : > { %90 = sbr.rel (%p87_p2) target bundleno = 618 (0x26a), region = 24  ;;  %s359_s16 = smov (!%p87_p2), 0  }
   0xb   : > { %v110_v0 = vlaneseq  ;;  %s386_s7 = smov (!%p103_p3, %s230_s7), 1  ;;  %v323_v2 = vmov -1.0   ;;  %v307_v4 = vmov 0  }
   0xc   : > { %s235_s8 = sshll.u32 %s386_s7, 2  ;;  %s109_s11 = scalar_lea.vmem %s384_s1, %s386_s7 }
   0xd   : > { %v344_v1 = vand.u32 127, %v110_v0  ;;  %s355_s14 = scalar_lea.vmem %s383_s0, %s235_s8 }
   0xf   : > { %vm112_vm0 = vcmp.lt.s32.totalorder %v344_v1, 64 }
  0x10   : > { %v113_v3 = vsel %vm112_vm0, 1e+38, %v323_v2  }
  0x11   : > { %v311_v5 = vmov %v113_v3  }
  0x12 LB: >> { %v127_v6 = vld [vmem:[%s355_s14] sm:$0x7]  ;;  %v123_v7 = vstv %s321_s16  ;;  %v125_v8 = vstv %s317_s15  ;;  %vm132_vm1 = vcmask 1042432   ;;  %s119_s16 = sadd.s32 1, %s321_s16   ;;  %s321_s16 = sphi %s359_s16, %s119_s16   ;;  %s317_s15 = sphi %s357_s15, %s241_s15   ;;  %v313_v5 = vphi %v311_v5, %v145_v5   ;;  %v309_v4 = vphi %v307_v4, %v308_v4  }
  0x13   : >> { %vm124_vm2 = vcmp.eq.s32.totalorder %v344_v1, %v123_v7  ;;  %vm128_vm3 = vcmp.eq.s32.totalorder %v344_v1, %v125_v8  ;;  %p116_p4 = scmp.ge.s32.totalorder %s119_s16, 16  }
  0x14   : >> { %v131_v9 = vsel %vm128_vm3, %v127_v6, 0.0  ;;  %v126_v10 = vsel %vm124_vm2, %v125_v8, %v309_v4   ;;  %vm167_vm6 = vcmask (%p116_p4), 122880  }
  0x15   : >> { %v133_v11 = vsel %vm132_vm1, %v131_v9, 0.0  ;;  %v308_v4 = vmov %v126_v10   ;;  %168 = vst.msk [vmem:[%s109_s11] sm:$0x1] (%p116_p4), %vm167_vm6, %v126_v10 }
  0x16   : >> { %134 = vadd.xlane.f32.xlu0 %v133_v11 }
  0x89   : >> { %v135_v12 = vpop.xlane.xlu0 %134 }
  0x8a   : >> { %v136_v13 = vsub.f32 %v127_v6, %v135_v12 }
  0x8c   : >> { %v137_v14 = vmul.f32 %v136_v13, %v136_v13 }
  0x8e   : >> { %v138_v15 = vsel %vm132_vm1, %v137_v14, 0.0 }
  0x8f   : >> { %v139_v16 = vrot.slane %v138_v15, 4 }
  0x91   : >> { %v140_v17 = vadd.f32 %v139_v16, %v138_v15 }
  0x93   : >> { %v141_v18 = vrot.slane %v140_v17, 2 }
  0x95   : >> { %v142_v19 = vadd.f32 %v141_v18, %v140_v17 }
  0x97   : >> { %v143_v20 = vrot.slane %v142_v19, 1 }
  0x99   : >> { %v144_v21 = vadd.f32 %v143_v20, %v142_v19 }
  0x9b   : >> { %v145_v5 = vmin.f32 %v313_v5, %v144_v21  }
  0x9d   : >> { %146 = vmax.xlane.f32.xlu0 %v145_v5 }
 0x110   : >> { %v147_v22 = vpop.xlane.xlu0 %146 }
 0x111   : >> { %238 = vpush %v147_v22 }
 0x142   : >> { %s239_s17 = spop %238 }
 0x143   : >> { %v149_v23 = vstv %s239_s17 }
 0x144   : >> { %vm150_vm4 = vcmp.ge.f32.partialorder %v145_v5, %v149_v23 }
 0x145   : >> { %v151_v24 = vsel %vm150_vm4, %v344_v1, 128 }
 0x146   : >> { %v153_v25 = vshra.s32 %v151_v24, 16  ;;  %v152_v27 = vand.u32 65535, %v151_v24 }
 0x148   : >> { %v155_v26 = vcvt.s32.f32 %v153_v25  ;;  %v154_v29 = vcvt.s32.f32 %v152_v27 }
 0x14a   : >> { %156 = vmin.xlane.f32.xlu1 %v155_v26 }
 0x1bd   : >> { %v157_v28 = vpop.xlane.xlu1 %156 }
 0x1be   : >> { %vm158_vm5 = vcmp.eq.f32.partialorder %v155_v26, %v157_v28  ;;  %v163_v31 = vcvt.f32.s32 %v157_v28 }
 0x1bf   : >> { %v159_v30 = vsel %vm158_vm5, %v154_v29, inf }
 0x1c0   : >> { %160 = vmin.xlane.f32.xlu1 %v159_v30  ;;  %v164_v33 = vshll.u32 %v163_v31, 16 }
 0x233   : >> { %v161_v32 = vpop.xlane.xlu1 %160 }
 0x234   : >> { %v162_v34 = vcvt.f32.s32 %v161_v32 }
 0x236   : >> { %v165_v35 = vadd.s32 %v164_v33, %v162_v34 }
 0x238   : >> { %240 = vpush %v165_v35 }
 0x265   : > { %118 = sbr.rel (!%p116_p4) target bundleno = 18 (0x12), region = 61 }
 0x269   : >> { %s241_s15 = spop %240  }
 0x26a PF: > { %s11_s6 = sadd.s32 1, %s305_s6  }
 0x26b   : > { %p8_p5 = scmp.ge.s32.totalorder %s11_s6, 4  }
 0x26d   :  { %10 = sbr.rel (!%p8_p5) target bundleno = 1 (0x1), region = 72 }

</bundles_post_ra>
